<compile_context>
chip_gen: v7x
topology: tpu7x:2x2x1
jax: 0.10.0
libtpu: 0.0.40
codegen_flags: <defaults>
</compile_context>

<pallas_src>
from functools import partial

import jax
import jax.numpy as jnp
from jax import lax
from jax.experimental import pallas as pl
from jax.experimental.pallas import tpu as pltpu


def _sigmoid(z):
    # Single EUP push (tanh) per vreg; exact sigmoid.
    return 0.5 * jnp.tanh(0.5 * z) + 0.5


def _mlp_kernel(x_ref, w1_ref, b1_ref, w2_ref, b2_ref, w3_ref, b3_ref, o_ref,
                *, matmul_dtype):
    # x block is [tb, D_in] (batch on sublanes, PyTorch layout straight from HBM).
    x = x_ref[...]
    # Contract D_in of W1 (dim 1) against D_in of x (dim 1) -> [H1, tb]:
    # batch lands on the 128-lane axis, so sigmoid vregs and the final store
    # are lane-dense.  f32 accumulate regardless of operand dtype.
    z1 = lax.dot_general(w1_ref[...], x, (((1,), (1,)), ((), ())),
                         preferred_element_type=jnp.float32) + b1_ref[...]
    h1 = _sigmoid(z1)                                            # f32 [H1, tb]
    z2 = jnp.dot(w2_ref[...], h1.astype(matmul_dtype),
                 preferred_element_type=jnp.float32) + b2_ref[...]
    h2 = _sigmoid(z2)                                            # f32 [H2, tb]
    y = jnp.dot(w3_ref[...], h2.astype(matmul_dtype),
                preferred_element_type=jnp.float32) + b3_ref[...]
    o_ref[...] = y.astype(o_ref.dtype)                           # lane-dense store


def _pick_batch_tile(B, max_tile=1024):
    # Big tiles (grid is a serial loop on v5e/v6e, per-step cost ~0.35us), but
    # keep >= 2 grid steps when possible so the "parallel" batch axis can feed
    # both v7x TensorCores.  Multiple of 128 keeps lane/sublane tiling happy
    # for both f32 and bf16 operands.
    if B <= 128:
        return 128
    half = -(-B // 2)                       # ceil(B / 2)
    return max(128, min(max_tile, ((half + 127) // 128) * 128))


@partial(jax.jit, static_argnames=("batch_tile", "matmul_dtype"))
def double_hidden_forward(x, w1, b1, w2, b2, w3, b3, *,
                          batch_tile=None, matmul_dtype=jnp.float32):
    """Forward pass of the double-hidden MLP.

    x : [B, D_in]   (PyTorch activation layout)
    wK: [out, in]   (PyTorch nn.Linear weight layout)
    bK: [out]
    matmul_dtype: operand dtype for the MXU (use jnp.bfloat16 on v6e/v7x);
                  accumulation, bias-add and sigmoid stay float32.
    Returns [B, D_out] float32.
    """
    B, D_in = x.shape
    H1 = w1.shape[0]
    H2 = w2.shape[0]
    D_out = w3.shape[0]

    tb = _pick_batch_tile(B) if batch_tile is None else batch_tile
    n_tiles = pl.cdiv(B, tb)                # ragged last tile handled by Pallas

    # Matmul operands (x + weights) in matmul_dtype; biases stay f32 columns.
    xm = x.astype(matmul_dtype)
    w1m = w1.astype(matmul_dtype)
    w2m = w2.astype(matmul_dtype)
    w3m = w3.astype(matmul_dtype)
    b1c = b1.reshape(H1, 1).astype(jnp.float32)
    b2c = b2.reshape(H2, 1).astype(jnp.float32)
    b3c = b3.reshape(D_out, 1).astype(jnp.float32)

    # Weights/biases: constant index_map -> resident in VMEM (one DMA total).
    resident = lambda shape: pl.BlockSpec(shape, lambda i: (0, 0))

    mm_bytes = jnp.dtype(matmul_dtype).itemsize
    cost = pl.CostEstimate(
        flops=2 * B * (D_in * H1 + H1 * H2 + H2 * D_out),
        transcendentals=B * (H1 + H2),
        bytes_accessed=(B * D_in * mm_bytes                       # x
                        + (D_in * H1 + H1 * H2 + H2 * D_out) * mm_bytes  # W
                        + (H1 + H2 + D_out) * 4                   # biases
                        + D_out * B * 4))                         # y

    y_t = pl.pallas_call(
        partial(_mlp_kernel, matmul_dtype=matmul_dtype),
        out_shape=jax.ShapeDtypeStruct((D_out, B), jnp.float32),
        grid=(n_tiles,),
        in_specs=[
            pl.BlockSpec((tb, D_in), lambda i: (i, 0)),   # x tile, pipelined
            resident((H1, D_in)), resident((H1, 1)),
            resident((H2, H1)), resident((H2, 1)),
            resident((D_out, H2)), resident((D_out, 1)),
        ],
        out_specs=pl.BlockSpec((D_out, tb), lambda i: (0, i)),
        compiler_params=pltpu.CompilerParams(
            dimension_semantics=("parallel",)),           # v7x: use both TCs
        cost_estimate=cost,
    )(xm, w1m, b1c, w2m, b2c, w3m, b3c)

    # Back to PyTorch layout; fuses with the rest under jit.
    return y_t.T


def _init_linear(key, fan_in, fan_out):
    # PyTorch nn.Linear default init: U(-1/sqrt(fan_in), 1/sqrt(fan_in)),
    # weight stored [out, in], bias [out].
    kw, kb = jax.random.split(key)
    bound = 1.0 / jnp.sqrt(jnp.float32(fan_in))
    w = jax.random.uniform(kw, (fan_out, fan_in), jnp.float32, -bound, bound)
    b = jax.random.uniform(kb, (fan_out,), jnp.float32, -bound, bound)
    return w, b


def _reference(x, w1, b1, w2, b2, w3, b3):
    hi = lax.Precision.HIGHEST
    h1 = jax.nn.sigmoid(jnp.dot(x, w1.T, precision=hi) + b1)
    h2 = jax.nn.sigmoid(jnp.dot(h1, w2.T, precision=hi) + b2)
    return jnp.dot(h2, w3.T, precision=hi) + b3


if __name__ == "__main__":
    # params = {'FEATURE_DIM': 16, 'HIDDEN_1': 32, 'HIDDEN_2': 32, 'OUTPUT_DIM': 8}
    # B=300 keeps shapes small while exercising >=2 grid tiles and the ragged
    # (non-multiple-of-tile) last tile path.
    B, D_in, H1, H2, D_out = 300, 16, 32, 32, 8

    key = jax.random.PRNGKey(0)
    kx, k1, k2, k3 = jax.random.split(key, 4)

    x = jax.random.normal(kx, (B, D_in), jnp.float32)
    w1, b1 = _init_linear(k1, D_in, H1)
    w2, b2 = _init_linear(k2, H1, H2)
    w3, b3 = _init_linear(k3, H2, D_out)

    ref = _reference(x, w1, b1, w2, b2, w3, b3)

    # f32-operand path (default; exact sigmoid -> tight tolerance).
    out = jax.block_until_ready(double_hidden_forward(x, w1, b1, w2, b2, w3, b3))
    assert out.shape == (B, D_out)
    assert jnp.allclose(out, ref, atol=1e-5, rtol=1e-5), "f32 mismatch vs reference"

    # bf16-operand matmul path (v6e/v7x MXU-native; f32 accumulate + f32 sigmoid).
    out_bf16 = jax.block_until_ready(
        double_hidden_forward(x, w1, b1, w2, b2, w3, b3, matmul_dtype=jnp.bfloat16))
    assert jnp.allclose(out_bf16, ref, atol=2e-2, rtol=2e-2), "bf16 mismatch vs reference"

    print("KERNEL_OK")
</pallas_src>

<mosaic_0001>
module attributes {stable_mosaic.version = 11 : i64} {
  func.func @_mlp_kernel(%arg0: i32, %arg1: memref<256x16xf32, #tpu.memory_space<vmem>>, %arg2: memref<32x16xf32, #tpu.memory_space<vmem>>, %arg3: memref<32x1xf32, #tpu.memory_space<vmem>>, %arg4: memref<32x32xf32, #tpu.memory_space<vmem>>, %arg5: memref<32x1xf32, #tpu.memory_space<vmem>>, %arg6: memref<8x32xf32, #tpu.memory_space<vmem>>, %arg7: memref<8x1xf32, #tpu.memory_space<vmem>>, %arg8: memref<8x256xf32, #tpu.memory_space<vmem>>) attributes {dimension_semantics = [#tpu.dimension_semantics<parallel>], iteration_bounds = array<i64: 2>, scalar_prefetch = 0 : i64, scratch_operands = 0 : i64, tpu.core_type = #tpu.core_type<tc>, window_params = [{transform_indices = @transform_0, window_bounds = array<i64: 256, 16>}, {pipeline_mode = #tpu.pipeline_mode<synchronous>, transform_indices = @transform_1, window_bounds = array<i64: 32, 16>}, {pipeline_mode = #tpu.pipeline_mode<synchronous>, transform_indices = @transform_2, window_bounds = array<i64: 32, 1>}, {pipeline_mode = #tpu.pipeline_mode<synchronous>, transform_indices = @transform_3, window_bounds = array<i64: 32, 32>}, {pipeline_mode = #tpu.pipeline_mode<synchronous>, transform_indices = @transform_4, window_bounds = array<i64: 32, 1>}, {pipeline_mode = #tpu.pipeline_mode<synchronous>, transform_indices = @transform_5, window_bounds = array<i64: 8, 32>}, {pipeline_mode = #tpu.pipeline_mode<synchronous>, transform_indices = @transform_6, window_bounds = array<i64: 8, 1>}, {transform_indices = @transform_7, window_bounds = array<i64: 8, 256>}]} {
    %c0 = arith.constant 0 : index
    %c0_0 = arith.constant 0 : index
    %0 = vector.load %arg1[%c0, %c0_0] : memref<256x16xf32, #tpu.memory_space<vmem>>, vector<256x16xf32>
    %c0_1 = arith.constant 0 : index
    %c0_2 = arith.constant 0 : index
    %1 = vector.load %arg2[%c0_1, %c0_2] : memref<32x16xf32, #tpu.memory_space<vmem>>, vector<32x16xf32>
    %cst = arith.constant dense<0.000000e+00> : vector<32x256xf32>
    %2 = tpu.matmul %1, %0, %cst {dimension_numbers = #tpu.dot_dimension_numbers<[1], [1], [0], [0], [0, 0, 1, 0], [], []>} : vector<32x16xf32>, vector<256x16xf32>, vector<32x256xf32> -> vector<32x256xf32>
    %c0_3 = arith.constant 0 : index
    %c0_4 = arith.constant 0 : index
    %3 = vector.load %arg3[%c0_3, %c0_4] : memref<32x1xf32, #tpu.memory_space<vmem>>, vector<32x1xf32>
    %4 = vector.broadcast %3 : vector<32x1xf32> to vector<32x256xf32>
    %5 = arith.addf %2, %4 : vector<32x256xf32>
    %cst_5 = arith.constant 5.000000e-01 : f32
    %6 = vector.broadcast %cst_5 : f32 to vector<32x256xf32>
    %7 = arith.mulf %6, %5 : vector<32x256xf32>
    %8 = math.tanh %7 : vector<32x256xf32>
    %cst_6 = arith.constant 5.000000e-01 : f32
    %9 = vector.broadcast %cst_6 : f32 to vector<32x256xf32>
    %10 = arith.mulf %9, %8 : vector<32x256xf32>
    %cst_7 = arith.constant 5.000000e-01 : f32
    %11 = vector.broadcast %cst_7 : f32 to vector<32x256xf32>
    %12 = arith.addf %10, %11 : vector<32x256xf32>
    %c0_8 = arith.constant 0 : index
    %c0_9 = arith.constant 0 : index
    %13 = vector.load %arg4[%c0_8, %c0_9] : memref<32x32xf32, #tpu.memory_space<vmem>>, vector<32x32xf32>
    %cst_10 = arith.constant dense<0.000000e+00> : vector<32x256xf32>
    %14 = tpu.matmul %13, %12, %cst_10 {dimension_numbers = #tpu.dot_dimension_numbers<[1], [0], [0], [1], [0, 0, 1, 1], [], []>} : vector<32x32xf32>, vector<32x256xf32>, vector<32x256xf32> -> vector<32x256xf32>
    %c0_11 = arith.constant 0 : index
    %c0_12 = arith.constant 0 : index
    %15 = vector.load %arg5[%c0_11, %c0_12] : memref<32x1xf32, #tpu.memory_space<vmem>>, vector<32x1xf32>
    %16 = vector.broadcast %15 : vector<32x1xf32> to vector<32x256xf32>
    %17 = arith.addf %14, %16 : vector<32x256xf32>
    %cst_13 = arith.constant 5.000000e-01 : f32
    %18 = vector.broadcast %cst_13 : f32 to vector<32x256xf32>
    %19 = arith.mulf %18, %17 : vector<32x256xf32>
    %20 = math.tanh %19 : vector<32x256xf32>
    %cst_14 = arith.constant 5.000000e-01 : f32
    %21 = vector.broadcast %cst_14 : f32 to vector<32x256xf32>
    %22 = arith.mulf %21, %20 : vector<32x256xf32>
    %cst_15 = arith.constant 5.000000e-01 : f32
    %23 = vector.broadcast %cst_15 : f32 to vector<32x256xf32>
    %24 = arith.addf %22, %23 : vector<32x256xf32>
    %c0_16 = arith.constant 0 : index
    %c0_17 = arith.constant 0 : index
    %25 = vector.load %arg6[%c0_16, %c0_17] : memref<8x32xf32, #tpu.memory_space<vmem>>, vector<8x32xf32>
    %cst_18 = arith.constant dense<0.000000e+00> : vector<8x256xf32>
    %26 = tpu.matmul %25, %24, %cst_18 {dimension_numbers = #tpu.dot_dimension_numbers<[1], [0], [0], [1], [0, 0, 1, 1], [], []>} : vector<8x32xf32>, vector<32x256xf32>, vector<8x256xf32> -> vector<8x256xf32>
    %c0_19 = arith.constant 0 : index
    %c0_20 = arith.constant 0 : index
    %27 = vector.load %arg7[%c0_19, %c0_20] : memref<8x1xf32, #tpu.memory_space<vmem>>, vector<8x1xf32>
    %28 = vector.broadcast %27 : vector<8x1xf32> to vector<8x256xf32>
    %29 = arith.addf %26, %28 : vector<8x256xf32>
    %c0_21 = arith.constant 0 : index
    %c0_22 = arith.constant 0 : index
    %30 = vector.load %arg8[%c0_21, %c0_22] : memref<8x256xf32, #tpu.memory_space<vmem>>, vector<8x256xf32>
    tpu.vector_store %arg8[%c0_21, %c0_22], %29 {strides = array<i32>} : memref<8x256xf32, #tpu.memory_space<vmem>>, vector<8x256xf32>,
    return
  }
  func.func @transform_0(%arg0: i32) -> (i32, i32) {
    %c0_i32 = arith.constant 0 : i32
    %c0_i32_0 = arith.constant 0 : i32
    return %arg0, %c0_i32 : i32, i32
  }
  func.func @transform_1(%arg0: i32) -> (i32, i32) {
    %c0_i32 = arith.constant 0 : i32
    %c0_i32_0 = arith.constant 0 : i32
    %c0_i32_1 = arith.constant 0 : i32
    return %c0_i32, %c0_i32_0 : i32, i32
  }
  func.func @transform_2(%arg0: i32) -> (i32, i32) {
    %c0_i32 = arith.constant 0 : i32
    %c0_i32_0 = arith.constant 0 : i32
    %c0_i32_1 = arith.constant 0 : i32
    return %c0_i32, %c0_i32_0 : i32, i32
  }
  func.func @transform_3(%arg0: i32) -> (i32, i32) {
    %c0_i32 = arith.constant 0 : i32
    %c0_i32_0 = arith.constant 0 : i32
    %c0_i32_1 = arith.constant 0 : i32
    return %c0_i32, %c0_i32_0 : i32, i32
  }
  func.func @transform_4(%arg0: i32) -> (i32, i32) {
    %c0_i32 = arith.constant 0 : i32
    %c0_i32_0 = arith.constant 0 : i32
    %c0_i32_1 = arith.constant 0 : i32
    return %c0_i32, %c0_i32_0 : i32, i32
  }
  func.func @transform_5(%arg0: i32) -> (i32, i32) {
    %c0_i32 = arith.constant 0 : i32
    %c0_i32_0 = arith.constant 0 : i32
    %c0_i32_1 = arith.constant 0 : i32
    return %c0_i32, %c0_i32_0 : i32, i32
  }
  func.func @transform_6(%arg0: i32) -> (i32, i32) {
    %c0_i32 = arith.constant 0 : i32
    %c0_i32_0 = arith.constant 0 : i32
    %c0_i32_1 = arith.constant 0 : i32
    return %c0_i32, %c0_i32_0 : i32, i32
  }
  func.func @transform_7(%arg0: i32) -> (i32, i32) {
    %c0_i32 = arith.constant 0 : i32
    %c0_i32_0 = arith.constant 0 : i32
    return %c0_i32, %arg0 : i32, i32
  }
}

</mosaic_0001>

<bundles_post_ra>
// kernel: double_hidden_forward.1
= control target key start
LH: loop header
LB: loop body
LE: loop exit
PB: predicated region body
PF: predicated region fallthrough
CT: control target
= control target key end

     0   :  { %12 = vsyncpa [#allocation3], 0  ;;  %s1517_s0 = inlined_call_operand.vmem [shape: f32[300,16], index: 0, kind: input, shape index: {}]   ;;  %s1518_s1 = inlined_call_operand.vmem [shape: f32[32,16], index: 1, kind: input, shape index: {}]   ;;  %s1519_s2 = inlined_call_operand.vmem [shape: f32[32,1], index: 2, kind: input, shape index: {}]   ;;  %s1520_s3 = inlined_call_operand.vmem [shape: f32[32,32], index: 3, kind: input, shape index: {}]   ;;  %s1521_s4 = inlined_call_operand.vmem [shape: f32[32,1], index: 4, kind: input, shape index: {}]   ;;  %s1522_s5 = inlined_call_operand.vmem [shape: f32[8,32], index: 5, kind: input, shape index: {}]   ;;  %s1523_s6 = inlined_call_operand.vmem [shape: f32[8,1], index: 6, kind: input, shape index: {}]   ;;  %s1524_s7 = inlined_call_operand.hbm [shape: f32[8,300], index: 7, kind: output, shape index: {}]  }
   0x1   :  { %14 = vsyncpa [#allocation3 + $0x1], 0  ;;  %s1262_s24 = smov 0   ;;  %s1264_s25 = smov 0  }
   0x2   :  { %s1266_s26 = smov 0   ;;  %s1268_s27 = smov 0  }
   0x3 LB: > { %s1283_s28 = sadd.s32 4294967295, %s1217_s27   ;;  %s919_s29 = sadd.s32 4294967294, %s1217_s27   ;;  %s1217_s27 = sphi %s1268_s27, %s1532_s27   ;;  %s1213_s26 = sphi %s1266_s26, %s1531_s26   ;;  %s1209_s25 = sphi %s1264_s25, %s1530_s25   ;;  %s1205_s24 = sphi %s1262_s24, %s1529_s24  }
   0x4   : > { %s1287_s30 = sadd.s32 1, %s1217_s27   ;;  %s179_s8 = sadd.s32 1, %s1213_s26 }
   0x5   : > { %s176_s9 = ssub.s32 %s1217_s27, %s1287_s30  ;;  %p189_p0 = scmp.ne.s32.totalorder %s1213_s26, %s1209_s25 }
   0x6   : > { %p177_p1 = scmp.eq.s32.totalorder %s176_s9, 0  ;;  %p190_p2 = scmp.eq.s32.totalorder %s1283_s28, 1 }
   0x7   : > { %p195_p3 = scmp.ne.s32.totalorder %s1209_s25, %s1205_s24  ;;  %p196_p4 = scmp.eq.s32.totalorder %s919_s29, 1 }
   0x8   : > { %s1298_s10 = scalar_select %p177_p1, %s1213_s26, %s179_s8  }
   0x9   : > { %p1300_p5 = por %p190_p2, %p189_p0  ;;  %p1304_p6 = por %p196_p4, %p195_p3 }
   0xa   : > { %p922_p7 = scmp.ge.s32.totalorder %s1217_s27, 1  ;;  %p249_p8 = scmp.lt.s32.totalorder %s1217_s27, 3 }
   0xc   : > { %p250_p9 = pnand %p922_p7, %p249_p8 }
   0xd   : > { %s924_s13 = sshll.u32 (!%p250_p9), %s1283_s28, 5  ;;  %vm364_vm0 = vcmask (!%p250_p9), 130048   ;;  %v1314_v0 = vld [vmem:[%s1518_s1] sm:$0xff] (!%p250_p9)  ;;  %v1219_v1 = vmov (!%p250_p9), 0   ;;  %v342_v3 = vld [vmem:[%s1519_s2 + $0x10] sm:$0xff] (!%p250_p9)  ;;  %v341_v4 = vld [vmem:[%s1519_s2 + $0x8] sm:$0xff] (!%p250_p9) }
   0xe   : > { %253 = sbr.rel (%p250_p9) target bundleno = 834 (0x342), region = 48  ;;  %p290_p10 = scmp.lt.s32.totalorder (!%p250_p9), %s924_s13, 37  ;;  %1009 = vmatprep.mubr.msk.f32.mxu0 (!%p250_p9), %vm364_vm0, %v1314_v0  ;;  %1121 = vset.pattern.permute.xlu0 (!%p250_p9), %v1219_v1  ;;  %v340_v2 = vld [vmem:[%s1519_s2] sm:$0xff] (!%p250_p9)  ;;  %v343_v5 = vld [vmem:[%s1519_s2 + $0x18] sm:$0xff] (!%p250_p9)  ;;  %vm1337_vm1 = vmpackc.low (!%p250_p9), %vm364_vm0, %vm364_vm0  ;;  %v1220_v63 = vmov (!%p250_p9), 0.0   ;;  %vm622_vm2 = vcmask (!%p250_p9), 261120  }
   0xf   : > { %346 = vperm.xlu0 (!%p250_p9), %1121, %v340_v2   ;;  %1122 = vset.pattern.permute.xlu1 (!%p250_p9), %v1219_v1  ;;  %v598_v7 = vld [vmem:[%s1521_s4] sm:$0xff] (!%p250_p9)  ;;  %v599_v8 = vld [vmem:[%s1521_s4 + $0x8] sm:$0xff] (!%p250_p9)  ;;  %v600_v18 = vld [vmem:[%s1521_s4 + $0x10] sm:$0xff] (!%p250_p9)  ;;  %s282_s9 = sand.u32 (!%p250_p9), 1, %s1209_s25  }
  0x10   : > { %356 = vperm.xlu1 (!%p250_p9), %1122, %v342_v3   ;;  %v601_v21 = vld [vmem:[%s1521_s4 + $0x18] sm:$0xff] (!%p250_p9)  ;;  %v757_v25 = vld [vmem:[%s1523_s6] sm:$0xff] (!%p250_p9)  ;;  %v337_v60 = vld [vmem:[%s1518_s1 + $0x8] sm:$0xff] (!%p250_p9)  ;;  %699 = vmatprep.mubr.f32.mxu1 (!%p250_p9), %v1220_v63  ;;  %s923_s15 = sshll.u32 (!%p250_p9), %s282_s9, 4 }
  0x11   : > { %v338_v61 = vld [vmem:[%s1518_s1 + $0x10] sm:$0xff] (!%p250_p9)  ;;  %v339_v62 = vld [vmem:[%s1518_s1 + $0x18] sm:$0xff] (!%p250_p9) }
  0x13   : > { %351 = vperm.xlu0 (!%p250_p9), %1121, %v341_v4  }
  0x14   : > { %361 = vperm.xlu1 (!%p250_p9), %1122, %v343_v5  }
  0x15   : > { %s1534_s13 = smov (!%p290_p10, %s924_s13), 37  ;;  %s968_s16 = sshll.u32 (%p1300_p5), %s1283_s28, 1 }
  0x16   : > { %s925_s29 = sshll.u32 %s1534_s13, 3  ;;  %s1463_s13 = scalar_lea.sflag [#allocation3], %s282_s9 }
  0x17   : > { %s1333_s14 = scalar_lea.vmem %s1517_s0, %s925_s29  ;;  %604 = vperm.xlu0 %1121, %v598_v7   ;;  %s848_s17 = ssub.s32 (%p1300_p5), 3, %s968_s16 }
  0x18   : > { %v320_v9 = vld [vmem:[%s1333_s14 + $0x80] sm:$0xff]  ;;  %v321_v10 = vld [vmem:[%s1333_s14 + $0x88] sm:$0xff]  ;;  %v322_v14 = vld [vmem:[%s1333_s14 + $0x90] sm:$0xff]  ;;  %609 = vperm.xlu1 %1122, %v599_v8   ;;  %p849_p11 = scmp.lt.s32.totalorder (%p1300_p5), %s848_s17, 2 }
  0x19   : > { %v304_v11 = vld [vmem:[%s1333_s14] sm:$0xff]  ;;  %v1017_v12 = vpack.c.bf16 %v321_v10, %v320_v9  ;;  %v305_v13 = vld [vmem:[%s1333_s14 + $0x8] sm:$0xff]  ;;  %v323_v15 = vld [vmem:[%s1333_s14 + $0x98] sm:$0xff] }
  0x1a   : > { %v1020_v16 = vpack.c.bf16 %v305_v13, %v304_v11  ;;  %v1023_v17 = vpack.c.bf16 %v323_v15, %v322_v14  ;;  %v306_v19 = vld [vmem:[%s1333_s14 + $0x10] sm:$0xff]  ;;  %v307_v20 = vld [vmem:[%s1333_s14 + $0x18] sm:$0xff]  ;;  %v324_v22 = vld [vmem:[%s1333_s14 + $0xa0] sm:$0xff] }
  0x1b   : > { %1019 = vmatprep.subr.msk.bf16.mxu0 %vm1337_vm1, %v1017_v12  ;;  %v325_v23 = vld [vmem:[%s1333_s14 + $0xa8] sm:$0xff]  ;;  %614 = vperm.xlu0 %1121, %v600_v18   ;;  %v1026_v24 = vpack.c.bf16 %v307_v20, %v306_v19  ;;  %v308_v27 = vld [vmem:[%s1333_s14 + $0x20] sm:$0xff]  ;;  %v326_v29 = vld [vmem:[%s1333_s14 + $0xb0] sm:$0xff] }
  0x1c   : > { %1022 = vmatpush3.bf16.xpose.msk.msra.mxu0 %vm1337_vm1, %v1020_v16  ;;  %619 = vperm.xlu1 %1122, %v601_v21   ;;  %v1029_v26 = vpack.c.bf16 %v325_v23, %v324_v22  ;;  %v309_v28 = vld [vmem:[%s1333_s14 + $0x28] sm:$0xff]  ;;  %v327_v30 = vld [vmem:[%s1333_s14 + $0xb8] sm:$0xff]  ;;  %v310_v33 = vld [vmem:[%s1333_s14 + $0x30] sm:$0xff] }
  0x1d   : > { %1025 = vmatprep.subr.msk.bf16.mxu0 %vm1337_vm1, %v1023_v17  ;;  %v1032_v31 = vpack.c.bf16 %v309_v28, %v308_v27  ;;  %v1035_v32 = vpack.c.bf16 %v327_v30, %v326_v29  ;;  %v311_v34 = vld [vmem:[%s1333_s14 + $0x38] sm:$0xff]  ;;  %v328_v35 = vld [vmem:[%s1333_s14 + $0xc0] sm:$0xff]  ;;  %v329_v36 = vld [vmem:[%s1333_s14 + $0xc8] sm:$0xff] }
  0x1e   : > { %v1038_v37 = vpack.c.bf16 %v311_v34, %v310_v33  ;;  %v1041_v38 = vpack.c.bf16 %v329_v36, %v328_v35  ;;  %v312_v39 = vld [vmem:[%s1333_s14 + $0x40] sm:$0xff]  ;;  %v313_v40 = vld [vmem:[%s1333_s14 + $0x48] sm:$0xff]  ;;  %v330_v41 = vld [vmem:[%s1333_s14 + $0xd0] sm:$0xff] }
  0x1f   : > { %760 = vperm.xlu0 %1121, %v757_v25   ;;  %v331_v42 = vld [vmem:[%s1333_s14 + $0xd8] sm:$0xff]  ;;  %v1044_v43 = vpack.c.bf16 %v313_v40, %v312_v39  ;;  %v314_v45 = vld [vmem:[%s1333_s14 + $0x50] sm:$0xff]  ;;  %v332_v47 = vld [vmem:[%s1333_s14 + $0xe0] sm:$0xff] }
  0x20   : > { %v1047_v44 = vpack.c.bf16 %v331_v42, %v330_v41  ;;  %v315_v46 = vld [vmem:[%s1333_s14 + $0x58] sm:$0xff]  ;;  %v333_v48 = vld [vmem:[%s1333_s14 + $0xe8] sm:$0xff]  ;;  %v316_v51 = vld [vmem:[%s1333_s14 + $0x60] sm:$0xff] }
  0x21   : > { %v1050_v49 = vpack.c.bf16 %v315_v46, %v314_v45  ;;  %v1053_v50 = vpack.c.bf16 %v333_v48, %v332_v47  ;;  %v317_v52 = vld [vmem:[%s1333_s14 + $0x68] sm:$0xff]  ;;  %v334_v53 = vld [vmem:[%s1333_s14 + $0xf0] sm:$0xff]  ;;  %v335_v54 = vld [vmem:[%s1333_s14 + $0xf8] sm:$0xff] }
  0x22   : > { %v1056_v55 = vpack.c.bf16 %v317_v52, %v316_v51  ;;  %v1059_v56 = vpack.c.bf16 %v335_v54, %v334_v53  ;;  %v318_v57 = vld [vmem:[%s1333_s14 + $0x70] sm:$0xff]  ;;  %v319_v58 = vld [vmem:[%s1333_s14 + $0x78] sm:$0xff]  ;;  %s284_s14 = scalar_lea.vmem [#allocation2], %s923_s15 }
  0x23   : > { %v1062_v59 = vpack.c.bf16 %v319_v58, %v318_v57  ;;  %v595_v57 = vld [vmem:[%s1520_s3 + $0x8] sm:$0xff]  ;;  %v596_v58 = vld [vmem:[%s1520_s3 + $0x10] sm:$0xff] }
  0x24   : > { %1028 = vmatpush3.bf16.xpose.msk.msra.mxu0 %vm1337_vm1, %v1026_v24 }
  0x25   : > { %1031 = vmatprep.subr.msk.bf16.mxu0 %vm1337_vm1, %v1029_v26 }
  0x2c   : > { %1034 = vmatpush3.bf16.xpose.msk.msra.mxu0 %vm1337_vm1, %v1032_v31 }
  0x2d   : > { %1037 = vmatprep.subr.msk.bf16.mxu0 %vm1337_vm1, %v1035_v32 }
  0x34   : > { %1040 = vmatpush3.bf16.xpose.msk.msra.mxu0 %vm1337_vm1, %v1038_v37 }
  0x35   : > { %1043 = vmatprep.subr.msk.bf16.mxu0 %vm1337_vm1, %v1041_v38 }
  0x3c   : > { %1046 = vmatpush3.bf16.xpose.msk.msra.mxu0 %vm1337_vm1, %v1044_v43 }
  0x3d   : > { %1049 = vmatprep.subr.msk.bf16.mxu0 %vm1337_vm1, %v1047_v44 }
  0x44   : > { %1052 = vmatpush3.bf16.xpose.msk.msra.mxu0 %vm1337_vm1, %v1050_v49 }
  0x45   : > { %1055 = vmatprep.subr.msk.bf16.mxu0 %vm1337_vm1, %v1053_v50 }
  0x4c   : > { %1058 = vmatpush3.bf16.xpose.msk.msra.mxu0 %vm1337_vm1, %v1056_v55 }
  0x4d   : > { %1061 = vmatprep.subr.msk.bf16.mxu0 %vm1337_vm1, %v1059_v56  ;;  %v594_v56 = vld [vmem:[%s1520_s3] sm:$0xff] }
  0x54   : > { %1064 = vmatpush3.bf16.xpose.msk.msra.mxu0 %vm1337_vm1, %v1062_v59  ;;  %v597_v59 = vld [vmem:[%s1520_s3 + $0x18] sm:$0xff] }
  0x5b   : > { %1010 = vmatmul.mubr.msk.f32.vlgmr.msra.gmra.mrb[0].mxu0 %vm364_vm0, %v1314_v0 }
  0x5c   : > { %1011 = vmatprep.mubr.msk.f32.mxu0 %vm364_vm0, %v337_v60 }
  0x5f   : > { %1012 = vmatmul.mubr.msk.f32.gmra.mrb[2].mxu0 %vm364_vm0, %v337_v60 }
  0x60   : > { %1013 = vmatprep.mubr.msk.f32.mxu0 %vm364_vm0, %v338_v61 }
  0x63   : > { %1014 = vmatmul.mubr.msk.f32.gmra.mrb[4].mxu0 %vm364_vm0, %v338_v61 }
  0x64   : > { %1015 = vmatprep.mubr.msk.f32.mxu0 %vm364_vm0, %v339_v62 }
  0x67   : > { %1016 = vmatmul.mubr.msk.f32.gmra.mrb[6].mxu0 %vm364_vm0, %v339_v62 }
  0x8e   : > { %v347_v0 = vpop.permute.xlu0 %346 }
  0x8f   : > { %v357_v11 = vpop.permute.xlu1 %356 }
  0x92   : > { %v352_v6 = vpop.permute.xlu0 %351 }
  0x93   : > { %v362_v20 = vpop.permute.xlu1 %361 }
  0x96   : > { %v605_v60 = vpop.permute.xlu0 %604 }
 0x12e   : > { %v539_v1 = vpop.f32.mrb[0].mxu0 }
 0x12f   : > { %v540_v2 = vadd.f32 %v539_v1, %v347_v0  ;;  %v541_v3 = vpop.f32.mrb[1].mxu0 }
 0x130   : > { %v542_v4 = vadd.f32 %v541_v3, %v347_v0  ;;  %v610_v3 = vpop.permute.xlu1 %609 }
 0x131   : > { %v562_v5 = vmul.f32 0.5, %v540_v2 }
 0x132   : > { %v563_v7 = vmul.f32 0.5, %v542_v4  ;;  %v545_v8 = vpop.f32.mrb[2].mxu0 }
 0x133   : > { %1123 = vtanh.f32 %v562_v5  ;;  %v546_v9 = vadd.f32 %v545_v8, %v352_v6  ;;  %v547_v10 = vpop.f32.mrb[3].mxu0 }
 0x134   : > { %1125 = vtanh.f32 %v563_v7  ;;  %v548_v12 = vadd.f32 %v547_v10, %v352_v6  ;;  %v615_v10 = vpop.permute.xlu0 %614 }
 0x135   : > { %v564_v13 = vmul.f32 0.5, %v546_v9 }
 0x136   : > { %v565_v14 = vmul.f32 0.5, %v548_v12  ;;  %v551_v15 = vpop.f32.mrb[4].mxu0 }
 0x137   : > { %1127 = vtanh.f32 %v564_v13  ;;  %v552_v16 = vadd.f32 %v551_v15, %v357_v11  ;;  %v553_v17 = vpop.f32.mrb[5].mxu0 }
 0x138   : > { %1129 = vtanh.f32 %v565_v14  ;;  %v554_v18 = vadd.f32 %v553_v17, %v357_v11 }
 0x139   : > { %v566_v19 = vmul.f32 0.5, %v552_v16  ;;  %v620_v16 = vpop.permute.xlu1 %619 }
 0x13a   : > { %v567_v21 = vmul.f32 0.5, %v554_v18  ;;  %v557_v22 = vpop.f32.mrb[6].mxu0 }
 0x13b   : > { %1131 = vtanh.f32 %v566_v19  ;;  %v558_v23 = vadd.f32 %v557_v22, %v362_v20  ;;  %v559_v24 = vpop.f32.mrb[7].mxu0 }
 0x13c   : > { %1133 = vtanh.f32 %v567_v21  ;;  %v560_v25 = vadd.f32 %v559_v24, %v362_v20 }
 0x13d   : > { %v1124_v26 = vpop.eup %1123  ;;  %v568_v27 = vmul.f32 0.5, %v558_v23 }
 0x13e   : > { %v1126_v28 = vpop.eup %1125  ;;  %v569_v29 = vmul.f32 0.5, %v560_v25  ;;  %v578_v30 = vmul.f32 0.5, %v1124_v26 }
 0x13f   : > { %1135 = vtanh.f32 %v568_v27  ;;  %v579_v32 = vmul.f32 0.5, %v1126_v28 }
 0x140   : > { %1137 = vtanh.f32 %v569_v29  ;;  %v586_v36 = vadd.f32 0.5, %v578_v30 }
 0x141   : > { %v1128_v31 = vpop.eup %1127  ;;  %v587_v39 = vadd.f32 0.5, %v579_v32 }
 0x142   : > { %v1130_v33 = vpop.eup %1129  ;;  %v580_v34 = vmul.f32 0.5, %v1128_v31 }
 0x143   : > { %v581_v35 = vmul.f32 0.5, %v1130_v33 }
 0x144   : > { %v588_v37 = vadd.f32 0.5, %v580_v34 }
 0x145   : > { %v1132_v38 = vpop.eup %1131  ;;  %v589_v40 = vadd.f32 0.5, %v581_v35 }
 0x146   : > { %v1134_v41 = vpop.eup %1133  ;;  %v1067_v42 = vpack.c.bf16 %v588_v37, %v586_v36  ;;  %v582_v44 = vmul.f32 0.5, %v1132_v38 }
 0x147   : > { %v1065_v43 = vpack.c.bf16 %v589_v40, %v587_v39  ;;  %v583_v46 = vmul.f32 0.5, %v1134_v41 }
 0x148   : > { %v590_v50 = vadd.f32 0.5, %v582_v44 }
 0x149   : > { %v1136_v45 = vpop.eup %1135  ;;  %1066 = vmatprep.subr.bf16.mxu1 %v1065_v43  ;;  %v591_v52 = vadd.f32 0.5, %v583_v46 }
 0x14a   : > { %v1138_v47 = vpop.eup %1137  ;;  %v584_v48 = vmul.f32 0.5, %v1136_v45  ;;  %1068 = vmatpush1.bf16.msra.mxu1 %v1067_v42 }
 0x14b   : > { %v585_v49 = vmul.f32 0.5, %v1138_v47 }
 0x14c   : > { %v592_v51 = vadd.f32 0.5, %v584_v48 }
 0x14d   : > { %v593_v53 = vadd.f32 0.5, %v585_v49 }
 0x14e   : > { %v1071_v54 = vpack.c.bf16 %v592_v51, %v590_v50 }
 0x14f   : > { %v1069_v55 = vpack.c.bf16 %v593_v53, %v591_v52  ;;  %v756_v52 = vld [vmem:[%s1522_s5] sm:$0xff]  ;;  %v761_v53 = vpop.permute.xlu0 %760 }
 0x151   : > { %1070 = vmatprep.subr.bf16.mxu1 %v1069_v55 }
 0x152   : > { %1072 = vmatpush1.bf16.msra.mxu1 %v1071_v54 }
 0x155   : > { %962 = vmatmul.mubr.msk.f32.vlgmr.msra.gmra.mrb[0].mxu1 %vm622_vm2, %v594_v56 }
 0x156   : > { %705 = vmatprep.mubr.f32.mxu1 %v1220_v63 }
 0x159   : > { %963 = vmatmul.mubr.msk.f32.gmra.mrb[2].mxu1 %vm622_vm2, %v595_v57 }
 0x15a   : > { %711 = vmatprep.mubr.f32.mxu1 %v1220_v63 }
 0x15d   : > { %964 = vmatmul.mubr.msk.f32.gmra.mrb[4].mxu1 %vm622_vm2, %v596_v58 }
 0x15e   : > { %717 = vmatprep.mubr.f32.mxu1 %v1220_v63 }
 0x161   : > { %965 = vmatmul.mubr.msk.f32.gmra.mrb[6].mxu1 %vm622_vm2, %v597_v59 }
 0x162   : > { %830 = vmatprep.mubr.f32.mxu1 %v1220_v63 }
 0x228   : > { %v701_v61 = vpop.f32.mrb[0].mxu1 }
 0x229   : > { %v702_v62 = vadd.f32 %v701_v61, %v605_v60  ;;  %v703_v0 = vpop.f32.mrb[1].mxu1 }
 0x22a   : > { %v704_v1 = vadd.f32 %v703_v0, %v605_v60 }
 0x22b   : > { %v724_v2 = vmul.f32 0.5, %v702_v62 }
 0x22c   : > { %v725_v4 = vmul.f32 0.5, %v704_v1  ;;  %v707_v5 = vpop.f32.mrb[2].mxu1 }
 0x22d   : > { %1139 = vtanh.f32 %v724_v2  ;;  %v708_v6 = vadd.f32 %v707_v5, %v610_v3  ;;  %v709_v7 = vpop.f32.mrb[3].mxu1 }
 0x22e   : > { %1141 = vtanh.f32 %v725_v4  ;;  %v710_v8 = vadd.f32 %v709_v7, %v610_v3 }
 0x22f   : > { %v726_v9 = vmul.f32 0.5, %v708_v6 }
 0x230   : > { %v727_v11 = vmul.f32 0.5, %v710_v8  ;;  %v713_v12 = vpop.f32.mrb[4].mxu1 }
 0x231   : > { %1143 = vtanh.f32 %v726_v9  ;;  %v714_v63 = vadd.f32 %v713_v12, %v615_v10  ;;  %v715_v13 = vpop.f32.mrb[5].mxu1 }
 0x232   : > { %1145 = vtanh.f32 %v727_v11  ;;  %v716_v14 = vadd.f32 %v715_v13, %v615_v10 }
 0x233   : > { %v728_v15 = vmul.f32 0.5, %v714_v63 }
 0x234   : > { %v729_v17 = vmul.f32 0.5, %v716_v14  ;;  %v719_v18 = vpop.f32.mrb[6].mxu1 }
 0x235   : > { %1147 = vtanh.f32 %v728_v15  ;;  %v720_v19 = vadd.f32 %v719_v18, %v620_v16  ;;  %v721_v20 = vpop.f32.mrb[7].mxu1 }
 0x236   : > { %1149 = vtanh.f32 %v729_v17  ;;  %v722_v21 = vadd.f32 %v721_v20, %v620_v16 }
 0x237   : > { %v1140_v22 = vpop.eup %1139  ;;  %v730_v23 = vmul.f32 0.5, %v720_v19 }
 0x238   : > { %v1142_v24 = vpop.eup %1141  ;;  %v731_v25 = vmul.f32 0.5, %v722_v21  ;;  %v740_v26 = vmul.f32 0.5, %v1140_v22 }
 0x239   : > { %1151 = vtanh.f32 %v730_v23  ;;  %v741_v28 = vmul.f32 0.5, %v1142_v24 }
 0x23a   : > { %1153 = vtanh.f32 %v731_v25  ;;  %v748_v32 = vadd.f32 0.5, %v740_v26 }
 0x23b   : > { %v1144_v27 = vpop.eup %1143  ;;  %v749_v35 = vadd.f32 0.5, %v741_v28 }
 0x23c   : > { %v1146_v29 = vpop.eup %1145  ;;  %v742_v30 = vmul.f32 0.5, %v1144_v27 }
 0x23d   : > { %v743_v31 = vmul.f32 0.5, %v1146_v29 }
 0x23e   : > { %v750_v33 = vadd.f32 0.5, %v742_v30 }
 0x23f   : > { %v1148_v34 = vpop.eup %1147  ;;  %v751_v36 = vadd.f32 0.5, %v743_v31 }
 0x240   : > { %v1150_v37 = vpop.eup %1149  ;;  %v1075_v38 = vpack.c.bf16 %v750_v33, %v748_v32  ;;  %v744_v40 = vmul.f32 0.5, %v1148_v34 }
 0x241   : > { %v1073_v39 = vpack.c.bf16 %v751_v36, %v749_v35  ;;  %v745_v42 = vmul.f32 0.5, %v1150_v37 }
 0x242   : > { %v752_v46 = vadd.f32 0.5, %v744_v40 }
 0x243   : > { %v1152_v41 = vpop.eup %1151  ;;  %1074 = vmatprep.subr.bf16.mxu1 %v1073_v39  ;;  %v753_v48 = vadd.f32 0.5, %v745_v42 }
 0x244   : > { %v1154_v43 = vpop.eup %1153  ;;  %v746_v44 = vmul.f32 0.5, %v1152_v41  ;;  %1076 = vmatpush1.bf16.msra.mxu1 %v1075_v38 }
 0x245   : > { %v747_v45 = vmul.f32 0.5, %v1154_v43 }
 0x246   : > { %v754_v47 = vadd.f32 0.5, %v746_v44 }
 0x247   : > { %v755_v49 = vadd.f32 0.5, %v747_v45 }
 0x248   : > { %v1079_v50 = vpack.c.bf16 %v754_v47, %v752_v46 }
 0x249   : > { %v1077_v51 = vpack.c.bf16 %v755_v49, %v753_v48 }
 0x24b   : > { %1078 = vmatprep.subr.bf16.mxu1 %v1077_v51 }
 0x24c   : > { %1080 = vmatpush1.bf16.msra.mxu1 %v1079_v50 }
 0x24f   : > { %966 = vmatmul.mubr.msk.f32.vlgmr.msra.gmra.mrb[8].mxu1 %vm622_vm2, %v756_v52 }
 0x320   : > { %846 = sbr.rel (!%p1300_p5) target bundleno = 834 (0x342), region = 52 }
 0x322   : > { %v832_v54 = vpop.f32.mrb[8].mxu1 }
 0x323   : > { %v833_v55 = vadd.f32 %v832_v54, %v761_v53  ;;  %v834_v56 = vpop.f32.mrb[9].mxu1 }
 0x324   : > { %v835_v57 = vadd.f32 %v834_v56, %v761_v53 }
 0x325   : > { %837 = vst [vmem:[%s284_s14] sm:$0xff] %v833_v55 }
 0x326   : > { %838 = vst [vmem:[%s284_s14 + $0x8] sm:$0xff] %v835_v57 }
 0x327   : > { %s1536_s17 = smov (!%p849_p11, %s848_s17), 2 }
 0x328   : > { %s1468_s18 = sshll.u32 %s1536_s17, 7 }
 0x329   : > { %s853_s19 = ssub.s32 256, %s1468_s18 }
 0x32a   : > { %854 = vsyncadd %s1463_s13, %s853_s19  ;;  %p970_p12 = scmp.ne.s32.totalorder %s1468_s18, 0  ;;  %s976_s20 = sshll.u32 %s1283_s28, 8 }
 0x32b   : > { %s1477_s22 = scalar_lea.hbm %s1524_s7, %s976_s20  ;;  %s860_s23 = sshll.u32 %s284_s14, 4  ;;  %s861_s23 = int_to_ptr.vmem [resolvable:$true] %s860_s23 }
 0x32c   : > { %s1155_s29 = scalar_lea.vmem %s861_s23, %s1468_s18  ;;  %s1221_s8 = smov [#allocation2]  }
 0x32d   : > { %p1156_p13 = scmp.ne.s32.totalorder %s861_s23, %s1155_s29  ;;  %s1159_s9 = sshll.u32 %s1221_s8, 4  ;;  %s1160_s9 = int_to_ptr.vmem [resolvable:$false] %s1159_s9 }
 0x32e   : > { %s1161_s15 = scalar_lea.vmem %s1160_s9, 512  ;;  %p1162_p2 = scmp.lt.s32.totalorder %s861_s23, %s1160_s9 }
 0x32f   : > { %p1157_p0 = pnand %p1156_p13, %p970_p12  ;;  %p1163_p3 = scmp.lt.s32.totalorder %s1161_s15, %s1155_s29 }
 0x331   : > { %p1158_p1 = pneg %p1157_p0  ;;  %p1164_p4 = por %p1163_p3, %p1162_p2 }
 0x333   : > { %p1165_p5 = pnand %p1164_p4, %p1158_p1 }
 0x335   : > { %1168 = shalt.err (!%p1165_p5)
}
 0x336   : > { %s1169_s28 = scalar_lea.hbm %s1477_s22, %s1468_s18  ;;  %s1173_s17 = scalar_lea.hbm %s1524_s7, 384 }
 0x337   : > { %p1170_p7 = scmp.ne.s32.totalorder %s1477_s22, %s1169_s28  ;;  %p1174_p10 = scmp.lt.u32.totalorder %s1477_s22, %s1524_s7 }
 0x338   : > { %p1175_p11 = scmp.lt.u32.totalorder %s1173_s17, %s1169_s28  ;;  %p1177_p0 = scmp.lt.u32.totalorder %s1169_s28, %s1477_s22 }
 0x339   : > { %p1171_p8 = pnand %p1170_p7, %p970_p12 }
 0x33a   : > { %p1176_p13 = por %p1175_p11, %p1174_p10 }
 0x33b   : > { %p1172_p9 = pneg %p1171_p8 }
 0x33c   : > { %p1178_p1 = por %p1177_p0, %p1176_p13 }
 0x33e   : > { %p1179_p2 = pnand %p1178_p1, %p1172_p9 }
 0x340   : > { %1182 = shalt.err (!%p1179_p2)
}
 0x341   : > { %863 = dma.vmem_to_hbm [thread:$0]  (%p970_p12), %s861_s23, %s1468_s18, %s1477_s22, %s1463_s13  }
 0x342 PF: > { %p1086_p3 = scmp.ge.s32.totalorder %s1217_s27, 2  ;;  %s872_s21 = sand.u32 1, %s1205_s24  }
 0x343   : > { %s873_s11 = scalar_lea.sflag [#allocation3], %s872_s21 }
 0x344   : > { %p1083_p4 = pnand %p1086_p3, %p1304_p6 }
 0x346   : > { %1200 = dma.done.wait (!%p1083_p4), %s873_s11, 256  }
 0x347   : > { %1202 = vsyncadd (!%p1083_p4), %s873_s11, 4294967040  ;;  %p17_p5 = scmp.ge.s32.totalorder %s1287_s30, 4   ;;  %s1529_s24 = smov %s1209_s25 }
 0x348   : > { %s1530_s25 = smov %s1213_s26  ;;  %s1531_s26 = smov %s1298_s10 }
 0x349   : > { %s1532_s27 = smov %s1287_s30  ;;  %19 = sbr.rel (!%p17_p5) target bundleno = 3 (0x3), region = 83 }
 0x350   :  { %878 = vsyncpa [#allocation3], 1 }
 0x351   :  { %880 = vsyncpa [#allocation3 + $0x1], 1 }

</bundles_post_ra>
